<compile_context>
chip_gen: v6e
topology: v6e:2x2x1
jax: 0.10.0
libtpu: 0.0.40
codegen_flags: <defaults>
</compile_context>

<pallas_src>
import functools

import jax
import jax.numpy as jnp
from jax.experimental import pallas as pl
from jax.experimental.pallas import tpu as pltpu


MAX_BLOCK_ROWS = 2048  # (2048, 128) f32 = 1 MiB per tile


def _round_up(a: int, b: int) -> int:
    return ((a + b - 1) // b) * b


def _pick_tiling(n_edges: int):
    """Pick (block_rows, n_blocks) for a lane-dense (rows, 128) f32 slab.

    Padding waste is bounded to <8 rows per block, and the grid has >=4 steps
    whenever there is enough work (>=2 steps per TensorCore on v7x megacore).
    """
    rows_needed = max(1, pl.cdiv(n_edges, 128))
    n_blocks = max(pl.cdiv(rows_needed, MAX_BLOCK_ROWS),
                   min(4, pl.cdiv(rows_needed, 8)))
    if n_blocks > 1 and n_blocks % 2:
        n_blocks += 1  # even split for the megacore "parallel" axis
    block_rows = _round_up(pl.cdiv(rows_needed, n_blocks), 8)
    return block_rows, n_blocks


# ------------------------- Pallas kernel (hot path) -------------------------

def _soft_transform_kernel(x_ref, r0_ref, out_ref, *, c):
    """out = p0 + (x - p0) * 0.5*(1 + tanh(c * (x/r0 - 25/24))),  p0 = 0.75*r0.

    Folding:  p1 - p0 = (7/12) r0,  m = (25/24) r0,  so  a = alpha/(p1-p0)
    becomes  c / r0  with  c = 12*alpha/7  baked in as a closure constant.
    """
    x = x_ref[...]                          # (block_rows, 128) f32
    r0 = r0_ref[...]                        # (block_rows, 128) f32

    p0 = 0.75 * r0
    # Full-precision reciprocal: approx=True adds ~1e-3 rel error inside tanh
    # for no wall-time gain on this HBM-bound kernel.
    rinv = pl.reciprocal(r0, approx=False)
    # TODO(synk): if a v7x bundle dump shows the single EUP slot (tanh) binding
    # at 3.2 TB/s HBM, swap jnp.tanh for a VPU rational approximation.
    s_x = 0.5 * (1.0 + jnp.tanh(c * (x * rinv - 25.0 / 24.0)))
    out_ref[...] = p0 + (x - p0) * s_x


def _soft_transform_slab(x_pad, r0_pad, block_rows, n_blocks, c):
    """x_pad, r0_pad: (n_blocks*block_rows, 128) f32 slabs."""
    block_bytes = block_rows * 128 * 4
    # 3 arrays x 2 pipeline buffers of actual block size, plus headroom.
    vmem_limit = 3 * 2 * block_bytes + 4 * 1024 * 1024

    return pl.pallas_call(
        functools.partial(_soft_transform_kernel, c=c),
        out_shape=jax.ShapeDtypeStruct(x_pad.shape, jnp.float32),
        grid=(n_blocks,),
        in_specs=[
            pl.BlockSpec((block_rows, 128), lambda i: (i, 0)),  # x tile
            pl.BlockSpec((block_rows, 128), lambda i: (i, 0)),  # r0 tile
        ],
        out_specs=pl.BlockSpec((block_rows, 128), lambda i: (i, 0)),
        compiler_params=pltpu.CompilerParams(
            dimension_semantics=("parallel",),
            vmem_limit_bytes=vmem_limit,
            # Let XLA fuse the pad/reshape (x) and gather+add (r0) producers
            # into the kernel's input DMAs instead of materializing x_pad /
            # r0_pad as separate HBM passes.
            allow_input_fusion=[True, True],
        ),
    )(x_pad, r0_pad)


# ----------------------------- Python wrapper --------------------------------

def soft_transform(x, node_attrs, edge_index, atomic_numbers,
                   covalent_radii, alpha=4.0):
    """
    x:              [n_edges, 1] f32   (edge lengths)
    node_attrs:     [n_nodes, n_elem]  one-hot f32
    edge_index:     [2, n_edges] int32
    atomic_numbers: [n_elem] int32
    covalent_radii: [119] f32          (buffer, synthetic here)
    returns:        [n_edges, 1] f32
    """
    n_edges = x.shape[0]
    block_rows, n_blocks = _pick_tiling(n_edges)
    rows = block_rows * n_blocks
    e_pad = rows * 128

    # --- glue: per-edge r_0 via gathers (plain JAX; fuses into the input DMAs
    # via allow_input_fusion when this wrapper is jitted). ---
    # TODO(synk): argmax over one-hot node_attrs + edge_index gathers stay in
    # plain JAX (data-dependent gather glue, not expressible as a BlockSpec).
    node_z = atomic_numbers[jnp.argmax(node_attrs, axis=1)]           # [n_nodes]
    # Pad the gather indices instead of padding r0 afterwards.  Padded entries
    # gather node 0, whose covalent radius is > 0 here, so dead lanes never
    # divide by zero.  (If a real radii table ever held zeros, guard with
    # jnp.maximum(r0, eps); dead lanes are sliced away regardless.)
    sender = jnp.pad(edge_index[0], (0, e_pad - n_edges))
    receiver = jnp.pad(edge_index[1], (0, e_pad - n_edges))
    z_u = node_z[sender].astype(jnp.int32)                            # [e_pad]
    z_v = node_z[receiver].astype(jnp.int32)                          # [e_pad]
    r0_pad = (covalent_radii[z_u] + covalent_radii[z_v]).astype(
        jnp.float32).reshape(rows, 128)

    x_pad = jnp.pad(x.reshape(-1).astype(jnp.float32),
                    (0, e_pad - n_edges)).reshape(rows, 128)

    # Fold the constants:  alpha/(p1-p0) = (12*alpha/7) / r0.
    c = 12.0 * float(alpha) / 7.0

    out_pad = _soft_transform_slab(x_pad, r0_pad, block_rows, n_blocks, c)
    # NOTE: consumers that can operate on the padded (rows, 128) slab should
    # take `out_pad` directly; this slice costs one extra read+write pass.
    return out_pad.reshape(-1)[:n_edges].reshape(n_edges, 1)


soft_transform_jit = jax.jit(soft_transform, static_argnames=("alpha",))


# ----------------------------- reference (JAX) --------------------------------

def soft_transform_ref(x, node_attrs, edge_index, atomic_numbers,
                       covalent_radii, alpha=4.0):
    node_z = atomic_numbers[jnp.argmax(node_attrs, axis=1)][:, None]   # [n_nodes,1]
    z_u = node_z[edge_index[0]].astype(jnp.int32)                      # [n_edges,1]
    z_v = node_z[edge_index[1]].astype(jnp.int32)
    r0 = covalent_radii[z_u] + covalent_radii[z_v]                     # [n_edges,1]
    p0 = 0.75 * r0
    p1 = (4.0 / 3.0) * r0
    m = 0.5 * (p0 + p1)
    a = alpha / (p1 - p0)
    s_x = 0.5 * (1.0 + jnp.tanh(a * (x - m)))
    return p0 + (x - p0) * s_x


# ---------------------------------- main --------------------------------------

if __name__ == "__main__":
    key = jax.random.PRNGKey(0)
    alpha = 4.0

    # Deterministic synthetic "covalent radii" buffer (119 entries like ase.data).
    covalent_radii = (0.31 + 0.02 * jnp.arange(119, dtype=jnp.float32))
    atomic_numbers = jnp.array([1, 6, 7, 8], dtype=jnp.int32)          # [n_elem]
    n_elem = atomic_numbers.shape[0]

    def make_case(subkey, n_nodes, n_edges):
        k1, k2, k3 = jax.random.split(subkey, 3)
        node_types = jax.random.randint(k1, (n_nodes,), 0, n_elem)
        node_attrs = jax.nn.one_hot(node_types, n_elem, dtype=jnp.float32)
        edge_index = jax.random.randint(k2, (2, n_edges), 0, n_nodes).astype(jnp.int32)
        x = (0.5 + 3.0 * jax.random.uniform(k3, (n_edges, 1))).astype(jnp.float32)
        return x, node_attrs, edge_index

    cases = [
        (8, 16),        # single block (8, 128)
        (32, 2000),     # 2 blocks of 8 rows
        (64, 20000),    # 4 blocks, block_rows > 8
    ]
    keys = jax.random.split(key, len(cases))

    for ck, (n_nodes, n_edges) in zip(keys, cases):
        x, node_attrs, edge_index = make_case(ck, n_nodes, n_edges)
        out = soft_transform_jit(x, node_attrs, edge_index, atomic_numbers,
                                 covalent_radii, alpha=alpha)
        out = jax.block_until_ready(out)
        ref = soft_transform_ref(x, node_attrs, edge_index, atomic_numbers,
                                 covalent_radii, alpha)
        assert out.shape == (n_edges, 1)
        assert jnp.allclose(out, ref, atol=2e-5, rtol=2e-5), (
            f"mismatch vs reference (n_edges={n_edges})")

    print("KERNEL_OK")
</pallas_src>

<mosaic_0001>
module attributes {stable_mosaic.version = 11 : i64} {
  func.func @_soft_transform_kernel(%arg0: i32, %arg1: memref<8x128xf32, #tpu.memory_space<vmem>>, %arg2: memref<8x128xf32, #tpu.memory_space<vmem>>, %arg3: memref<8x128xf32, #tpu.memory_space<vmem>>) attributes {dimension_semantics = [#tpu.dimension_semantics<parallel>], iteration_bounds = array<i64: 1>, scalar_prefetch = 0 : i64, scratch_operands = 0 : i64, tpu.core_type = #tpu.core_type<tc>, window_params = [{transform_indices = @transform_0, window_bounds = array<i64: 8, 128>}, {transform_indices = @transform_1, window_bounds = array<i64: 8, 128>}, {transform_indices = @transform_2, window_bounds = array<i64: 8, 128>}]} {
    %c0 = arith.constant 0 : index
    %c0_0 = arith.constant 0 : index
    %0 = vector.load %arg1[%c0, %c0_0] : memref<8x128xf32, #tpu.memory_space<vmem>>, vector<8x128xf32>
    %c0_1 = arith.constant 0 : index
    %c0_2 = arith.constant 0 : index
    %1 = vector.load %arg2[%c0_1, %c0_2] : memref<8x128xf32, #tpu.memory_space<vmem>>, vector<8x128xf32>
    %cst = arith.constant 7.500000e-01 : f32
    %2 = vector.broadcast %cst : f32 to vector<8x128xf32>
    %3 = arith.mulf %2, %1 : vector<8x128xf32>
    %4 = tpu.reciprocal %1 : vector<8x128xf32> -> vector<8x128xf32>
    %5 = arith.mulf %0, %4 : vector<8x128xf32>
    %cst_3 = arith.constant 1.04166663 : f32
    %6 = vector.broadcast %cst_3 : f32 to vector<8x128xf32>
    %7 = arith.subf %5, %6 : vector<8x128xf32>
    %cst_4 = arith.constant 6.85714293 : f32
    %8 = vector.broadcast %cst_4 : f32 to vector<8x128xf32>
    %9 = arith.mulf %8, %7 : vector<8x128xf32>
    %10 = math.tanh %9 : vector<8x128xf32>
    %cst_5 = arith.constant 1.000000e+00 : f32
    %11 = vector.broadcast %cst_5 : f32 to vector<8x128xf32>
    %12 = arith.addf %11, %10 : vector<8x128xf32>
    %cst_6 = arith.constant 5.000000e-01 : f32
    %13 = vector.broadcast %cst_6 : f32 to vector<8x128xf32>
    %14 = arith.mulf %13, %12 : vector<8x128xf32>
    %15 = arith.subf %0, %3 : vector<8x128xf32>
    %16 = arith.mulf %15, %14 : vector<8x128xf32>
    %17 = arith.addf %3, %16 : vector<8x128xf32>
    %c0_7 = arith.constant 0 : index
    %c0_8 = arith.constant 0 : index
    %18 = vector.load %arg3[%c0_7, %c0_8] : memref<8x128xf32, #tpu.memory_space<vmem>>, vector<8x128xf32>
    tpu.vector_store %arg3[%c0_7, %c0_8], %17 {strides = array<i32>} : memref<8x128xf32, #tpu.memory_space<vmem>>, vector<8x128xf32>,
    return
  }
  func.func @transform_0(%arg0: i32) -> (i32, i32) {
    %c0_i32 = arith.constant 0 : i32
    %c0_i32_0 = arith.constant 0 : i32
    return %arg0, %c0_i32 : i32, i32
  }
  func.func @transform_1(%arg0: i32) -> (i32, i32) {
    %c0_i32 = arith.constant 0 : i32
    %c0_i32_0 = arith.constant 0 : i32
    return %arg0, %c0_i32 : i32, i32
  }
  func.func @transform_2(%arg0: i32) -> (i32, i32) {
    %c0_i32 = arith.constant 0 : i32
    %c0_i32_0 = arith.constant 0 : i32
    return %arg0, %c0_i32 : i32, i32
  }
}

</mosaic_0001>

<bundles_post_ra>
// kernel: soft_transform.2
= control target key start
LH: loop header
LB: loop body
LE: loop exit
PB: predicated region body
PF: predicated region fallthrough
CT: control target
= control target key end

     0   :  { %v17_v4 = vlaneseq  ;;  %s96_s0 = inlined_call_operand.vmem [shape: f32[1024], index: 0, kind: input, shape index: {}]   ;;  %s97_s1 = inlined_call_operand.vmem [shape: f32[1024], index: 1, kind: input, shape index: {}]   ;;  %s98_s2 = inlined_call_operand.vmem [shape: f32[16], index: 2, kind: input, shape index: {}]   ;;  %s99_s3 = inlined_call_operand.<no memory space> [shape: f32[], index: 3, kind: input, shape index: {}]   ;;  %s100_s4 = inlined_call_operand.vmem [shape: f32[8,128], index: 4, kind: output, shape index: {}]  }
   0x1   :  { %v9_v0 = vstv %s99_s3  ;;  %v24_v1 = vld [vmem:[%s96_s0] sm:$0xff] }
   0x2   :  { %v25_v2 = vld [vmem:[%s97_s1] sm:$0xff]  ;;  %vm19_vm0 = vcmp.lt.s32.totalorder %v17_v4, 16 }
   0x3   :  { %v28_v3 = vadd.f32 %v25_v2, %v24_v1  ;;  %v16_v5 = vld [vmem:[%s98_s2] sm:$0x1] }
   0x4   :  { %v20_v6 = vsel %vm19_vm0, %v16_v5, %v9_v0 }
   0x5   :  { %52 = vrcp.f32 %v28_v3  ;;  %v35_v11 = vmul.f32 0.75, %v28_v3 }
   0x7   :  { %v43_v14 = vsub.f32 %v20_v6, %v35_v11 }
  0x12   :  { %v53_v7 = vpop.eup %52 }
  0x13   :  { %v37_v8 = vmul.f32 %v53_v7, %v20_v6 }
  0x15   :  { %v51_v9 = vadd.f32 -1.0416666, %v37_v8 }
  0x17   :  { %v39_v10 = vmul.f32 6.857143, %v51_v9 }
  0x19   :  { %54 = vtanh.f32 %v39_v10 }
  0x26   :  { %v55_v12 = vpop.eup %54 }
  0x27   :  { %v41_v13 = vadd.f32 1.0, %v55_v12 }
  0x29   :  { %v42_v15 = vmul.f32 0.5, %v41_v13 }
  0x2b   :  { %v44_v16 = vmul.f32 %v43_v14, %v42_v15 }
  0x2d   :  { %v45_v17 = vadd.f32 %v44_v16, %v35_v11 }
  0x2f   :  { %46 = vst [vmem:[%s100_s4] sm:$0xff] %v45_v17 }

</bundles_post_ra>
